<compile_context>
chip_gen: v6e
topology: v6e:2x2x1
jax: 0.10.0
libtpu: 0.0.40
codegen_flags: <defaults>
</compile_context>

<pallas_src>
import jax
import jax.numpy as jnp
import numpy as np
from jax.experimental import pallas as pl
from jax.experimental.pallas import tpu as pltpu


# ----------------------------------------------------------------------------- kernel

def _fused_gemm_bias_kernel(p_ref, w_ref, b_ref, o_ref):
    # p_ref: (TM, Kp) bf16 im2col patch rows
    # w_ref: (Kp, Np) bf16 fused complex block weight (resident across the grid)
    # b_ref: (1, Np)  f32 fused bias
    # o_ref: (TM, Np) lane-dense output tile
    acc = jnp.dot(p_ref[...], w_ref[...], preferred_element_type=jnp.float32)
    o_ref[...] = (acc + b_ref[...]).astype(o_ref.dtype)


# ----------------------------------------------------------------------------- wrapper

def _round_up(x, m):
    return (x + m - 1) // m * m


def _pick_vmem_limit_bytes():
    # Generation-aware VMEM cap: ~3/4 of physical, capped at 96 MiB (v5e/v6e) and
    # naturally ~48 MiB on v7x (64 MiB physical per TensorCore).
    try:
        phys = int(pltpu.get_tpu_info().vmem_capacity_bytes)
    except Exception:
        phys = 64 * 1024 * 1024
    return max(16 * 1024 * 1024, min((phys * 3) // 4, 96 * 1024 * 1024))


def complex_conv3d(x, wr, br, wi, bi, *, compute_dtype=jnp.bfloat16,
                   out_dtype=jnp.float32, tm=128):
    """x: (B, Cin, D, H, W) complex64.  wr/wi: (Cout, Cin, k, k, k) f32 (torch layout).
    br/bi: (Cout,) f32.  Returns (B, Cout, D, H, W) complex64.

    Note: out_dtype=jnp.bfloat16 halves HBM writeback (useful on v5e); f32 kept as the
    safe default here.
    """
    B, Cin, D, H, W = x.shape
    Cout = wr.shape[0]
    k = wr.shape[2]
    p = (k - 1) // 2                    # 'same' padding; assumes odd k (torch module)
    cin2, cout2 = 2 * Cin, 2 * Cout
    Kdim = k * k * k * cin2
    Kp = _round_up(Kdim, 128)           # lane-dense contraction for the patch tile
    Np = _round_up(cout2, 128)          # lane-dense output / weight tile

    # --- activations: channels-last, real|imag stacked along lanes, 'same' spatial pad
    xr = jnp.transpose(x.real, (0, 2, 3, 4, 1))            # (B, D, H, W, Cin)
    xi = jnp.transpose(x.imag, (0, 2, 3, 4, 1))
    xs = jnp.concatenate([xr, xi], axis=-1).astype(compute_dtype)   # (B,D,H,W,2Cin)
    xp = jnp.pad(xs, ((0, 0), (p, p), (p, p), (p, p), (0, 0)))

    # --- im2col: fold all k^3 taps into the contraction axis (order kd, kh, kw, chan)
    cols = []
    for kd in range(k):
        for kh in range(k):
            for kw in range(k):
                cols.append(xp[:, kd:kd + D, kh:kh + H, kw:kw + W, :])
    patches = jnp.concatenate(cols, axis=-1)               # (B, D, H, W, k^3*2Cin)

    M = B * D * H * W
    Mp = _round_up(M, tm)
    patches = patches.reshape(M, Kdim)
    patches = jnp.pad(patches, ((0, Mp - M), (0, Kp - Kdim)))   # (Mp, Kp)

    # --- fused complex block weight: [[Wr, Wi], [-Wi, Wr]]  (2Cin -> 2Cout)
    wr_t = jnp.transpose(wr, (2, 3, 4, 1, 0))              # (k, k, k, Cin, Cout)
    wi_t = jnp.transpose(wi, (2, 3, 4, 1, 0))
    w_top = jnp.concatenate([wr_t, wi_t], axis=-1)         # rows fed by x.real
    w_bot = jnp.concatenate([-wi_t, wr_t], axis=-1)        # rows fed by x.imag
    w_comb = jnp.concatenate([w_top, w_bot], axis=-2)      # (k, k, k, 2Cin, 2Cout)
    w_mat = w_comb.reshape(Kdim, cout2).astype(compute_dtype)
    w_mat = jnp.pad(w_mat, ((0, Kp - Kdim), (0, Np - cout2)))    # (Kp, Np)

    # biases: out_r gets (b_r - b_i), out_i gets (b_r + b_i); kept in f32
    b_comb = jnp.concatenate([br - bi, br + bi]).astype(jnp.float32)
    b_mat = jnp.pad(b_comb, (0, Np - cout2)).reshape(1, Np)

    out = pl.pallas_call(
        _fused_gemm_bias_kernel,
        out_shape=jax.ShapeDtypeStruct((Mp, Np), out_dtype),
        grid=(Mp // tm,),
        in_specs=[
            pl.BlockSpec((tm, Kp), lambda m: (m, 0)),
            pl.BlockSpec((Kp, Np), lambda m: (0, 0)),      # weight resident across grid
            pl.BlockSpec((1, Np), lambda m: (0, 0)),
        ],
        out_specs=pl.BlockSpec((tm, Np), lambda m: (m, 0)),
        compiler_params=pltpu.CompilerParams(
            dimension_semantics=("parallel",),
            vmem_limit_bytes=_pick_vmem_limit_bytes(),
        ),
    )(patches, w_mat, b_mat)

    # drop row/lane padding, split fused channels, restore NCDHW complex layout
    out = out[:M, :cout2].astype(jnp.float32).reshape(B, D, H, W, cout2)
    out_r = jnp.transpose(out[..., :Cout], (0, 4, 1, 2, 3))
    out_i = jnp.transpose(out[..., Cout:], (0, 4, 1, 2, 3))
    return jax.lax.complex(out_r, out_i)


# ----------------------------------------------------------------------------- reference

def _conv3d_ref(x, w, b, pad):
    out = jax.lax.conv_general_dilated(
        x, w, window_strides=(1, 1, 1),
        padding=[(pad, pad)] * 3,
        dimension_numbers=("NCDHW", "OIDHW", "NCDHW"),
        precision=jax.lax.Precision.HIGHEST,
    )
    return out + b[None, :, None, None, None]


def reference_complex_conv3d(x, wr, br, wi, bi):
    """Plain-JAX mirror of the PyTorch ComplexConv3d.forward."""
    k = wr.shape[2]
    pad = (k - 1) // 2
    out_r = _conv3d_ref(x.real, wr, br, pad) - _conv3d_ref(x.imag, wi, bi, pad)
    out_i = _conv3d_ref(x.imag, wr, br, pad) + _conv3d_ref(x.real, wi, bi, pad)
    return jax.lax.complex(out_r, out_i)


# ----------------------------------------------------------------------------- main

if __name__ == "__main__":
    B, Cin, Cout, K = 2, 2, 4, 3
    D, H, W = 8, 8, 8

    key = jax.random.PRNGKey(0)
    ks = jax.random.split(key, 6)

    xr = jax.random.normal(ks[0], (B, Cin, D, H, W), dtype=jnp.float32)
    xi = jax.random.normal(ks[1], (B, Cin, D, H, W), dtype=jnp.float32)
    x = jax.lax.complex(xr, xi)                             # (B, Cin, D, H, W) complex64

    scale = 0.1
    wr = scale * jax.random.normal(ks[2], (Cout, Cin, K, K, K), dtype=jnp.float32)
    wi = scale * jax.random.normal(ks[3], (Cout, Cin, K, K, K), dtype=jnp.float32)
    br = scale * jax.random.normal(ks[4], (Cout,), dtype=jnp.float32)
    bi = scale * jax.random.normal(ks[5], (Cout,), dtype=jnp.float32)

    out = jax.block_until_ready(complex_conv3d(x, wr, br, wi, bi))
    ref = jax.block_until_ready(reference_complex_conv3d(x, wr, br, wi, bi))

    # bf16 matmul inputs + f32 accumulation -> loose-ish tolerance vs f32 reference
    np.testing.assert_allclose(np.asarray(out), np.asarray(ref), rtol=5e-2, atol=5e-2)

    print("KERNEL_OK")
</pallas_src>

<mosaic_0001>
module attributes {stable_mosaic.version = 11 : i64} {
  func.func @_fused_gemm_bias_kernel(%arg0: i32, %arg1: memref<128x128xbf16, #tpu.memory_space<vmem>>, %arg2: memref<128x128xbf16, #tpu.memory_space<vmem>>, %arg3: memref<1x128xf32, #tpu.memory_space<vmem>>, %arg4: memref<128x128xf32, #tpu.memory_space<vmem>>) attributes {dimension_semantics = [#tpu.dimension_semantics<parallel>], iteration_bounds = array<i64: 8>, scalar_prefetch = 0 : i64, scratch_operands = 0 : i64, tpu.core_type = #tpu.core_type<tc>, window_params = [{transform_indices = @transform_0, window_bounds = array<i64: 128, 128>}, {pipeline_mode = #tpu.pipeline_mode<synchronous>, transform_indices = @transform_1, window_bounds = array<i64: 128, 128>}, {pipeline_mode = #tpu.pipeline_mode<synchronous>, transform_indices = @transform_2, window_bounds = array<i64: 1, 128>}, {transform_indices = @transform_3, window_bounds = array<i64: 128, 128>}]} {
    %c0 = arith.constant 0 : index
    %c0_0 = arith.constant 0 : index
    %0 = vector.load %arg1[%c0, %c0_0] : memref<128x128xbf16, #tpu.memory_space<vmem>>, vector<128x128xbf16>
    %c0_1 = arith.constant 0 : index
    %c0_2 = arith.constant 0 : index
    %1 = vector.load %arg2[%c0_1, %c0_2] : memref<128x128xbf16, #tpu.memory_space<vmem>>, vector<128x128xbf16>
    %cst = arith.constant dense<0.000000e+00> : vector<128x128xf32>
    %2 = tpu.matmul %0, %1, %cst {dimension_numbers = #tpu.dot_dimension_numbers<[1], [0], [0], [1], [0, 0, 1, 1], [], []>} : vector<128x128xbf16>, vector<128x128xbf16>, vector<128x128xf32> -> vector<128x128xf32>
    %c0_3 = arith.constant 0 : index
    %c0_4 = arith.constant 0 : index
    %3 = vector.load %arg3[%c0_3, %c0_4] : memref<1x128xf32, #tpu.memory_space<vmem>>, vector<1x128xf32>
    %4 = vector.broadcast %3 : vector<1x128xf32> to vector<128x128xf32>
    %5 = arith.addf %2, %4 : vector<128x128xf32>
    %c0_5 = arith.constant 0 : index
    %c0_6 = arith.constant 0 : index
    %6 = vector.load %arg4[%c0_5, %c0_6] : memref<128x128xf32, #tpu.memory_space<vmem>>, vector<128x128xf32>
    tpu.vector_store %arg4[%c0_5, %c0_6], %5 {strides = array<i32>} : memref<128x128xf32, #tpu.memory_space<vmem>>, vector<128x128xf32>,
    return
  }
  func.func @transform_0(%arg0: i32) -> (i32, i32) {
    %c0_i32 = arith.constant 0 : i32
    %c0_i32_0 = arith.constant 0 : i32
    return %arg0, %c0_i32 : i32, i32
  }
  func.func @transform_1(%arg0: i32) -> (i32, i32) {
    %c0_i32 = arith.constant 0 : i32
    %c0_i32_0 = arith.constant 0 : i32
    %c0_i32_1 = arith.constant 0 : i32
    return %c0_i32, %c0_i32_0 : i32, i32
  }
  func.func @transform_2(%arg0: i32) -> (i32, i32) {
    %c0_i32 = arith.constant 0 : i32
    %c0_i32_0 = arith.constant 0 : i32
    %c0_i32_1 = arith.constant 0 : i32
    return %c0_i32, %c0_i32_0 : i32, i32
  }
  func.func @transform_3(%arg0: i32) -> (i32, i32) {
    %c0_i32 = arith.constant 0 : i32
    %c0_i32_0 = arith.constant 0 : i32
    return %arg0, %c0_i32 : i32, i32
  }
}

</mosaic_0001>

<bundles_post_ra>
// kernel: tpu_custom_call.1
= control target key start
LH: loop header
LB: loop body
LE: loop exit
PB: predicated region body
PF: predicated region fallthrough
CT: control target
= control target key end

     0   :  { %8 = vsyncpa [#allocation3], 0  ;;  %s1093_s0 = inlined_call_operand.hbm [shape: bf16[1024,128], index: 0, kind: input, shape index: {}]   ;;  %s1094_s1 = inlined_call_operand.hbm [shape: bf16[128,128], index: 1, kind: input, shape index: {}]   ;;  %s1095_s2 = inlined_call_operand.vmem [shape: f32[1,128], index: 2, kind: input, shape index: {}]   ;;  %s1096_s3 = inlined_call_operand.hbm [shape: f32[1024,128], index: 3, kind: output, shape index: {}]  }
   0x1   :  { %10 = vsyncpa [#allocation3 + $0x1], 0 }
   0x2   :  { %11 = vsyncpa [#allocation6], 0 }
   0x3   :  { %12 = vsyncpa [#allocation4], 0 }
   0x4   :  { %14 = vsyncpa [#allocation4 + $0x1], 0  ;;  %s879_s12 = smov 0   ;;  %s881_s13 = smov 0  }
   0x5   :  { %s883_s14 = smov 0   ;;  %s885_s15 = smov 0  }
   0x6 LB: > { %s900_s16 = sadd.s32 4294967295, %s850_s15   ;;  %s552_s17 = sadd.s32 4294967294, %s850_s15   ;;  %s850_s15 = sphi %s885_s15, %s1117_s15   ;;  %s846_s14 = sphi %s883_s14, %s1116_s14   ;;  %s842_s13 = sphi %s881_s13, %s1115_s13   ;;  %s838_s12 = sphi %s879_s12, %s1114_s12  }
   0x7   : > { %p40_p0 = scmp.ne.s32.totalorder %s842_s13, %s838_s12  ;;  %p1097_p1 = scmp.eq.s32.totalorder %s900_s16, 0 }
   0x8   : > { %p112_p3 = scmp.eq.s32.totalorder %s552_s17, 7  ;;  %p553_p5 = scmp.ge.s32.totalorder %s850_s15, 1 }
   0x9   : > { %p909_p4 = por %p1097_p1, %p40_p0  ;;  %p119_p7 = scmp.lt.s32.totalorder %s850_s15, 9 }
   0xa   : > { %p914_p6 = por %p112_p3, %p40_p0  ;;  %s852_s21 = smov [#allocation5]  }
   0xb   : > { %s1101_s18 = scalar_select %p909_p4, 1, 0 }
   0xc   : > { %s1102_s19 = scalar_select %p914_p6, 1, 0 }
   0xd   : > { %p919_p8 = pnand %p553_p5, %p119_p7  ;;  %s131_s22 = sshll.u32 %s852_s21, 4  ;;  %s132_s22 = int_to_ptr.vmem [resolvable:$true] %s131_s22 }
   0xe   : > { %s932_s24 = sadd.s32 1, %s850_s15   ;;  %s27_s25 = sadd.s32 1, %s846_s14 }
   0xf   : > { %s1103_s20 = scalar_select %p919_p8, 1, 0 }
  0x10   : > { %p659_p9 = pneg %p919_p8  ;;  %s24_s26 = ssub.s32 %s850_s15, %s932_s24 }
  0x11   : > { %s739_s27 = scalar_lea.vmem %s132_s22, 1024  ;;  %p747_p3 = scmp.lt.s32.totalorder %s132_s22, %s132_s22 }
  0x12   : > { %p927_p10 = pnand %p659_p9, %p1097_p1  ;;  %p740_p12 = scmp.ne.s32.totalorder %s132_s22, %s739_s27 }
  0x13   : > { %p748_p5 = scmp.lt.s32.totalorder %s739_s27, %s739_s27 }
  0x14   : > { %p730_p11 = pneg %p927_p10 }
  0x15   : > { %p749_p7 = por %p748_p5, %p747_p3 }
  0x16   : > { %p742_p13 = pnand %p740_p12, %p730_p11 }
  0x18   : > { %p743_p0 = pneg %p742_p13 }
  0x1a   : > { %p750_p2 = pnand %p749_p7, %p743_p0 }
  0x1c   : > { %753 = shalt.err (!%p750_p2)
}
  0x1d   : > { %s853_s28 = smov 64   ;;  %s854_s29 = smov 4  }
  0x1e   : > { %662 = dma.hbm_to_vmem [thread:$0]  (!%p927_p10), %s1094_s1, 1024, %s132_s22, [#allocation6], %s853_s28, %s853_s28, %s854_s29  }
  0x1f   : > { %p25_p2 = scmp.eq.s32.totalorder %s24_s26, 0  ;;  %p34_p9 = scmp.ne.s32.totalorder %s846_s14, %s842_s13 }
  0x20   : > { %p35_p11 = scmp.eq.s32.totalorder %s850_s15, 0  ;;  %p672_p12 = scmp.lt.s32.totalorder %s850_s15, 8 }
  0x21   : > { %s952_s5 = scalar_select %p25_p2, %s846_s14, %s27_s25  }
  0x22   : > { %p36_p13 = por %p35_p11, %p34_p9  ;;  %p1105_p0 = scmp.eq.s32.totalorder %s900_s16, 7 }
  0x23   : > { %s148_s7 = sand.u32 1, %s846_s14   ;;  %s585_s8 = sshll.u32 %s850_s15, 10 }
  0x24   : > { %p956_p3 = por %p1105_p0, %p34_p9  ;;  %s556_s9 = sshll.u32 %s148_s7, 6 }
  0x25   : > { %s965_s17 = scalar_lea.hbm %s1093_s0, %s585_s8  ;;  %s152_s21 = scalar_lea.vmem [#allocation2], %s556_s9 }
  0x26   : > { %s1106_s6 = scalar_select %p956_p3, 1, 0 }
  0x27   : > { %s159_s22 = sshll.u32 %s152_s21, 4  ;;  %p967_p10 = pnand %p672_p12, %p36_p13  ;;  %s971_s22 = int_to_ptr.vmem [resolvable:$true] %s159_s22 }
  0x28   : > { %s973_s25 = scalar_lea.sflag [#allocation3], %s148_s7  ;;  %s754_s26 = scalar_lea.hbm %s965_s17, 1024 }
  0x29   : > { %p755_p5 = scmp.ne.s32.totalorder %s965_s17, %s754_s26  ;;  %p756_p7 = pneg %p967_p10 }
  0x2a   : > { %s759_s4 = scalar_lea.hbm %s1093_s0, 8192  ;;  %p760_p11 = scmp.lt.s32.totalorder %s965_s17, %s1093_s0 }
  0x2b   : > { %p757_p2 = pnand %p756_p7, %p755_p5  ;;  %p761_p12 = scmp.lt.s32.totalorder %s759_s4, %s754_s26 }
  0x2d   : > { %p758_p9 = pneg %p757_p2  ;;  %p762_p13 = por %p761_p12, %p760_p11 }
  0x2f   : > { %p763_p0 = pnand %p762_p13, %p758_p9 }
  0x31   : > { %766 = shalt.err (!%p763_p0)
}
  0x32   : > { %s767_s7 = scalar_lea.vmem %s971_s22, 1024  ;;  %s855_s10 = smov [#allocation2]  }
  0x33   : > { %p768_p1 = scmp.ne.s32.totalorder %s971_s22, %s767_s7  ;;  %s772_s11 = sshll.u32 %s855_s10, 4  ;;  %s773_s11 = int_to_ptr.vmem [resolvable:$false] %s772_s11 }
  0x34   : > { %s774_s21 = scalar_lea.vmem %s773_s11, 2048  ;;  %p775_p2 = scmp.lt.s32.totalorder %s971_s22, %s773_s11 }
  0x35   : > { %p770_p6 = pnand %p768_p1, %p756_p7  ;;  %p776_p3 = scmp.lt.s32.totalorder %s774_s21, %s767_s7 }
  0x37   : > { %p771_p5 = pneg %p770_p6  ;;  %p777_p4 = por %p776_p3, %p775_p2 }
  0x39   : > { %p778_p8 = pnand %p777_p4, %p771_p5 }
  0x3b   : > { %781 = shalt.err (!%p778_p8)
}
  0x3c   : > { %666 = dma.hbm_to_vmem [thread:$0]  (!%p967_p10), %s965_s17, 1024, %s971_s22, %s973_s25, %s853_s28, %s853_s28, %s854_s29  }
  0x3d   : > { %p1108_p1 = scmp.ne.s32.totalorder %s1103_s20, 0 }
  0x3e   : > { %s1000_s26 = sand.u32 (!%p1108_p1), 1, %s842_s13   ;;  %p1109_p4 = scmp.ne.s32.totalorder (!%p1108_p1), %s1101_s18, 0 }
  0x3f   : > { %171 = sbr.rel (%p1108_p1) target bundleno = 328 (0x148), region = 32  ;;  %s560_s27 = sshll.u32 (!%p1108_p1), %s1000_s26, 6 }
  0x40   : > { %s174_s30 = scalar_lea.sflag (!%p1108_p1), [#allocation3], %s1000_s26  ;;  %s1004_s4 = scalar_lea.vmem (!%p1108_p1), [#allocation2], %s560_s27 }
  0x44   : > { %825 = dma.done.wait (%p1109_p4), %s174_s30, 1024  }
  0x45   : > { %827 = vsyncadd (%p1109_p4), %s174_s30, 4294966272  ;;  %p1110_p6 = scmp.eq.s32.totalorder %s900_s16, 0 }
  0x47   : > { %829 = dma.done.wait (%p1110_p6), [#allocation6], 1024   ;;  %p1111_p8 = pmov %p1110_p6 }
  0x48   : > { %v712_v0 = vld [vmem:[#allocation5 + $0x38] sm:$0xff]   ;;  %v713_v1 = vld [vmem:[#allocation5 + $0x30] sm:$0xff]   ;;  %v714_v2 = vld [vmem:[#allocation5 + $0x28] sm:$0xff]   ;;  %s562_s18 = sshll.u32 %s1000_s26, 7  ;;  %s586_s17 = sshll.u32 %s900_s16, 11 }
  0x49   : > { %831 = vsyncadd (%p1111_p8), [#allocation6], 4294966272  ;;  %603 = vmatprep.subr.bf16.mxu0 %v712_v0  ;;  %635 = vmatprep.subr.bf16.mxu1 %v712_v0  ;;  %v715_v3 = vld [vmem:[#allocation5 + $0x20] sm:$0xff]   ;;  %v716_v6 = vld [vmem:[#allocation5 + $0x18] sm:$0xff]   ;;  %s1026_s29 = scalar_lea.vmem [#allocation7], %s562_s18  ;;  %s1045_s8 = scalar_lea.hbm %s1096_s3, %s586_s17 }
  0x4a   : > { %604 = vmatpush3.bf16.msra.mxu0 %v712_v0  ;;  %643 = vmatpush3.bf16.msra.mxu1 %v712_v0  ;;  %v720_v4 = vld [vmem:[%s1004_s4] sm:$0xff]   ;;  %v717_v7 = vld [vmem:[#allocation5 + $0x10] sm:$0xff]   ;;  %v718_v8 = vld [vmem:[#allocation5 + $0x8] sm:$0xff]   ;;  %s469_s22 = sshll.u32 %s1026_s29, 4  ;;  %s456_s16 = scalar_lea.sflag [#allocation4], %s1000_s26  ;;  %s1047_s22 = int_to_ptr.vmem [resolvable:$true] %s469_s22 }
  0x4b   : > { %605 = vmatprep.subr.bf16.mxu0 %v713_v1  ;;  %636 = vmatprep.subr.bf16.mxu1 %v713_v1  ;;  %v721_v5 = vld [vmem:[%s1004_s4 + $0x20] sm:$0xff]   ;;  %v722_v10 = vld [vmem:[%s1004_s4 + $0x8] sm:$0xff]   ;;  %v724_v12 = vld [vmem:[%s1004_s4 + $0x10] sm:$0xff]   ;;  %s782_s9 = scalar_lea.vmem %s1047_s22, 2048  ;;  %p1112_p10 = scmp.ne.s32.totalorder %s1106_s6, 0 }
  0x4c   : > { %619 = vmatprep.mubr.bf16.mxu0 %v720_v4  ;;  %627 = vmatprep.mubr.bf16.mxu1 %v721_v5  ;;  %v719_v9 = vld [vmem:[#allocation5] sm:$0xff]   ;;  %v723_v11 = vld [vmem:[%s1004_s4 + $0x28] sm:$0xff]   ;;  %v725_v13 = vld [vmem:[%s1004_s4 + $0x30] sm:$0xff]   ;;  %p783_p3 = scmp.ne.s32.totalorder %s1047_s22, %s782_s9  ;;  %s856_s7 = smov [#allocation7]  }
  0x4d   : > { %v726_v14 = vld [vmem:[%s1004_s4 + $0x18] sm:$0xff]   ;;  %v563_v16 = vld [vmem:[%s1095_s2] ss:$0 sm:$0xff]  ;;  %s786_s10 = sshll.u32 %s856_s7, 4  ;;  %s787_s10 = int_to_ptr.vmem [resolvable:$false] %s786_s10 }
  0x4e   : > { %606 = vmatpush3.bf16.msra.mxu0 %v713_v1  ;;  %644 = vmatpush3.bf16.msra.mxu1 %v713_v1  ;;  %v727_v15 = vld [vmem:[%s1004_s4 + $0x38] sm:$0xff]   ;;  %p784_p7 = pnand %p783_p3, %p1112_p10  ;;  %s788_s11 = scalar_lea.vmem %s787_s10, 4096 }
  0x4f   : > { %607 = vmatprep.subr.bf16.mxu0 %v714_v2  ;;  %637 = vmatprep.subr.bf16.mxu1 %v714_v2  ;;  %p789_p11 = scmp.lt.s32.totalorder %s1047_s22, %s787_s10  ;;  %p790_p12 = scmp.lt.s32.totalorder %s788_s11, %s782_s9 }
  0x50   : > { %p785_p9 = pneg %p784_p7 }
  0x51   : > { %p791_p13 = por %p790_p12, %p789_p11 }
  0x52   : > { %608 = vmatpush3.bf16.msra.mxu0 %v714_v2  ;;  %645 = vmatpush3.bf16.msra.mxu1 %v714_v2 }
  0x53   : > { %609 = vmatprep.subr.bf16.mxu0 %v715_v3  ;;  %638 = vmatprep.subr.bf16.mxu1 %v715_v3  ;;  %p792_p0 = pnand %p791_p13, %p785_p9 }
  0x56   : > { %610 = vmatpush3.bf16.msra.mxu0 %v715_v3  ;;  %646 = vmatpush3.bf16.msra.mxu1 %v715_v3 }
  0x57   : > { %611 = vmatprep.subr.bf16.mxu0 %v716_v6  ;;  %639 = vmatprep.subr.bf16.mxu1 %v716_v6 }
  0x5a   : > { %612 = vmatpush3.bf16.msra.mxu0 %v716_v6  ;;  %647 = vmatpush3.bf16.msra.mxu1 %v716_v6 }
  0x5b   : > { %613 = vmatprep.subr.bf16.mxu0 %v717_v7  ;;  %640 = vmatprep.subr.bf16.mxu1 %v717_v7 }
  0x5e   : > { %614 = vmatpush3.bf16.msra.mxu0 %v717_v7  ;;  %648 = vmatpush3.bf16.msra.mxu1 %v717_v7 }
  0x5f   : > { %615 = vmatprep.subr.bf16.mxu0 %v718_v8  ;;  %641 = vmatprep.subr.bf16.mxu1 %v718_v8 }
  0x62   : > { %616 = vmatpush3.bf16.msra.mxu0 %v718_v8  ;;  %649 = vmatpush3.bf16.msra.mxu1 %v718_v8 }
  0x63   : > { %617 = vmatprep.subr.bf16.mxu0 %v719_v9  ;;  %642 = vmatprep.subr.bf16.mxu1 %v719_v9 }
  0x66   : > { %618 = vmatpush3.bf16.msra.mxu0 %v719_v9  ;;  %650 = vmatpush3.bf16.msra.mxu1 %v719_v9 }
  0x69   : > { %620 = vmatmul.mubr.bf16.vlgmr.msra.gmra.mxu0 %v722_v10  ;;  %628 = vmatmul.mubr.bf16.vlgmr.msra.gmra.mxu1 %v723_v11 }
  0x6a   : > { %623 = vmatprep.mubr.bf16.mxu0 %v724_v12  ;;  %631 = vmatprep.mubr.bf16.mxu1 %v725_v13 }
  0x71   : > { %624 = vmatmul.mubr.bf16.gmra.mxu0 %v726_v14  ;;  %632 = vmatmul.mubr.bf16.gmra.mxu1 %v727_v15 }
 0x129   : > { %v621_v17 = vpop.f32.mrf.mxu0  ;;  %v629_v18 = vpop.f32.mrf.mxu1 }
 0x12a   : > { %v385_v19 = vadd.f32 %v621_v17, %v563_v16  ;;  %v417_v20 = vadd.f32 %v629_v18, %v563_v16 }
 0x12b   : > { %v376_v21 = vpop.f32.mrf.mxu0  ;;  %v408_v22 = vpop.f32.mrf.mxu1 }
 0x12c   : > { %441 = vst [vmem:[%s1026_s29 + $0x10] sm:$0xff] %v385_v19  ;;  %449 = vst [vmem:[%s1026_s29 + $0x50] sm:$0xff] %v417_v20  ;;  %v377_v23 = vadd.f32 %v563_v16, %v376_v21  ;;  %v409_v24 = vadd.f32 %v563_v16, %v408_v22 }
 0x12d   : > { %v622_v25 = vpop.f32.mrf.mxu0  ;;  %v630_v26 = vpop.f32.mrf.mxu1 }
 0x12e   : > { %439 = vst [vmem:[%s1026_s29] sm:$0xff] %v377_v23  ;;  %447 = vst [vmem:[%s1026_s29 + $0x40] sm:$0xff] %v409_v24  ;;  %v388_v27 = vadd.f32 %v622_v25, %v563_v16  ;;  %v420_v28 = vadd.f32 %v630_v26, %v563_v16 }
 0x12f   : > { %v379_v29 = vpop.f32.mrf.mxu0  ;;  %v411_v30 = vpop.f32.mrf.mxu1 }
 0x130   : > { %442 = vst [vmem:[%s1026_s29 + $0x18] sm:$0xff] %v388_v27  ;;  %450 = vst [vmem:[%s1026_s29 + $0x58] sm:$0xff] %v420_v28  ;;  %v380_v31 = vadd.f32 %v563_v16, %v379_v29  ;;  %v412_v32 = vadd.f32 %v563_v16, %v411_v30 }
 0x131   : > { %v625_v33 = vpop.f32.mrf.mxu0  ;;  %v633_v34 = vpop.f32.mrf.mxu1 }
 0x132   : > { %440 = vst [vmem:[%s1026_s29 + $0x8] sm:$0xff] %v380_v31  ;;  %448 = vst [vmem:[%s1026_s29 + $0x48] sm:$0xff] %v412_v32  ;;  %v401_v35 = vadd.f32 %v625_v33, %v563_v16  ;;  %v433_v36 = vadd.f32 %v633_v34, %v563_v16 }
 0x133   : > { %v392_v37 = vpop.f32.mrf.mxu0  ;;  %v424_v38 = vpop.f32.mrf.mxu1 }
 0x134   : > { %445 = vst [vmem:[%s1026_s29 + $0x30] sm:$0xff] %v401_v35  ;;  %453 = vst [vmem:[%s1026_s29 + $0x70] sm:$0xff] %v433_v36  ;;  %v393_v39 = vadd.f32 %v563_v16, %v392_v37  ;;  %v425_v40 = vadd.f32 %v563_v16, %v424_v38 }
 0x135   : > { %v626_v41 = vpop.f32.mrf.mxu0  ;;  %v634_v42 = vpop.f32.mrf.mxu1 }
 0x136   : > { %443 = vst [vmem:[%s1026_s29 + $0x20] sm:$0xff] %v393_v39  ;;  %451 = vst [vmem:[%s1026_s29 + $0x60] sm:$0xff] %v425_v40  ;;  %v404_v43 = vadd.f32 %v626_v41, %v563_v16  ;;  %v436_v44 = vadd.f32 %v634_v42, %v563_v16 }
 0x137   : > { %v395_v45 = vpop.f32.mrf.mxu0  ;;  %v427_v46 = vpop.f32.mrf.mxu1 }
 0x138   : > { %446 = vst [vmem:[%s1026_s29 + $0x38] sm:$0xff] %v404_v43  ;;  %454 = vst [vmem:[%s1026_s29 + $0x78] sm:$0xff] %v436_v44  ;;  %v396_v47 = vadd.f32 %v563_v16, %v395_v45  ;;  %v428_v48 = vadd.f32 %v563_v16, %v427_v46 }
 0x13a   : > { %444 = vst [vmem:[%s1026_s29 + $0x28] sm:$0xff] %v396_v47  ;;  %452 = vst [vmem:[%s1026_s29 + $0x68] sm:$0xff] %v428_v48 }
 0x13b   : > { %795 = shalt.err (!%p792_p0)
}
 0x13c   : > { %s796_s21 = scalar_lea.hbm %s1045_s8, 2048  ;;  %s800_s4 = scalar_lea.hbm %s1096_s3, 16384 }
 0x13d   : > { %p797_p5 = scmp.ne.s32.totalorder %s1045_s8, %s796_s21  ;;  %p801_p4 = scmp.lt.s32.totalorder %s1045_s8, %s1096_s3 }
 0x13e   : > { %p802_p6 = scmp.lt.s32.totalorder %s800_s4, %s796_s21 }
 0x13f   : > { %p798_p2 = pnand %p797_p5, %p1112_p10 }
 0x140   : > { %p803_p8 = por %p802_p6, %p801_p4 }
 0x141   : > { %p799_p1 = pneg %p798_p2 }
 0x143   : > { %p804_p3 = pnand %p803_p8, %p799_p1 }
 0x145   : > { %807 = shalt.err (!%p804_p3)
}
 0x146   : > { %s857_s28 = smov 128   ;;  %s858_s29 = smov 8  }
 0x147   : > { %657 = dma.vmem_to_hbm [thread:$0]  (%p1112_p10), %s1047_s22, 2048, %s1045_s8, %s456_s16, %s857_s28, %s857_s28, %s858_s29  }
 0x148 PF: > { %p674_p7 = scmp.ge.s32.totalorder %s850_s15, 2  ;;  %s484_s17 = sand.u32 1, %s838_s12  }
 0x149   : > { %p1113_p9 = scmp.ne.s32.totalorder %s1102_s19, 0  ;;  %s485_s23 = scalar_lea.sflag [#allocation4], %s484_s17 }
 0x14b   : > { %p668_p11 = pnand %p674_p7, %p1113_p9 }
 0x14d   : > { %p669_p12 = pneg %p668_p11 }
 0x14f   : > { %833 = dma.done.wait (%p669_p12), %s485_s23, 2048  }
 0x150   : > { %835 = vsyncadd (%p669_p12), %s485_s23, 4294965248  ;;  %p17_p13 = scmp.ge.s32.totalorder %s932_s24, 10   ;;  %s1114_s12 = smov %s842_s13 }
 0x151   : > { %s1115_s13 = smov %s846_s14  ;;  %s1116_s14 = smov %s952_s5 }
 0x152   : > { %s1117_s15 = smov %s932_s24  ;;  %19 = sbr.rel (!%p17_p13) target bundleno = 6 (0x6), region = 81 }
 0x157   :  { %490 = vsyncpa [#allocation3], 1 }
 0x158   :  { %492 = vsyncpa [#allocation3 + $0x1], 1 }
 0x159   :  { %493 = vsyncpa [#allocation6], 1 }
 0x15a   :  { %494 = vsyncpa [#allocation4], 1 }
 0x15b   :  { %496 = vsyncpa [#allocation4 + $0x1], 1 }

</bundles_post_ra>
